<compile_context>
chip_gen: v6e
topology: v6e:2x2x1
jax: 0.10.0
libtpu: 0.0.40
codegen_flags: <defaults>
</compile_context>

<pallas_src>
import jax
import jax.numpy as jnp
import numpy as np
from jax.experimental import pallas as pl
from jax.experimental.pallas import tpu as pltpu


# ---------------------------------------------------------------------------
# Kernel A: softmax over classes + negated per-class errors / bf16 fg masks
# ---------------------------------------------------------------------------
def _softmax_errors_kernel(pred_ref, lbl_ref, nerr_ref, fg_ref):
    logits = pred_ref[...].astype(jnp.float32)              # (C, T)
    lbl = lbl_ref[...]                                       # (1, T) int32
    C, T = logits.shape

    m = jnp.max(logits, axis=0, keepdims=True)               # (1, T)
    e = jnp.exp(logits - m)
    s = jnp.sum(e, axis=0, keepdims=True)
    prob = e / s                                              # (C, T)

    cls = jax.lax.broadcasted_iota(jnp.int32, (C, T), 0)
    onehot = cls == lbl                                       # (C, T) bool
    fg = onehot.astype(jnp.float32)

    valid = lbl >= 0                                          # padded pixels: label == -1
    # Negated error: the wrapper sorts ASCENDING on this key, i.e. descending
    # on |fg - p|.  Padded pixels get key 0 (the maximum) -> sort last and
    # contribute exactly 0 to the loss.
    nerr_ref[...] = jnp.where(valid, -jnp.abs(fg - prob), 0.0)
    fg_ref[...] = onehot.astype(jnp.bfloat16)                 # 0/1: exact in bf16


# ---------------------------------------------------------------------------
# Kernel B: Lovasz gradient + per-class dot product, accumulated over tiles
# ---------------------------------------------------------------------------
def _lovasz_accum_kernel(counts_ref, nerr_ref, fg_ref, loss_ref, carry_ref):
    C, T = nerr_ref.shape
    pid = pl.program_id(0)

    @pl.when(pid == 0)
    def _init():
        carry_ref[...] = jnp.zeros_like(carry_ref)
        loss_ref[...] = jnp.zeros_like(loss_ref)

    nerr = nerr_ref[...]                            # (C, T) negated sorted errors (<= 0)
    fg = fg_ref[...].astype(jnp.float32)            # (C, T) 0/1 foreground mask
    g = counts_ref[...]                             # (C, 1) total fg pixels per class

    lane = jax.lax.broadcasted_iota(jnp.int32, (C, T), 1)

    # Inclusive within-tile cumulative fg count: Hillis-Steele scan, log2(T)
    # roll+masked-add steps on the XLU/VPU.  No O(T^2) scratch, no MXU.
    f = fg
    k = 1
    while k < T:
        rolled = pltpu.roll(f, k, 1)                # rolled[l] = f[l - k]  (l >= k)
        f = f + jnp.where(lane >= k, rolled, 0.0)
        k *= 2
    f = f + carry_ref[...]                          # add cross-tile carry -> global F_i

    glob = pid * T + lane                           # global sorted position (int32)
    pos = glob.astype(jnp.float32)                  # NOTE: exact only for P < 2^24 pixels

    # jaccard_i = 1 - (G - F_i) / (G + (i+1) - F_i); denominator >= 1 always.
    jac = 1.0 - (g - f) / (g + (pos + 1.0) - f)
    # jaccard at the previous position (analytic); guard the i=0, G=0 corner (0/0).
    f_prev = f - fg
    denom_prev = jnp.maximum(g + pos - f_prev, 1.0)
    jac_prev = jnp.where(glob == 0, 0.0, 1.0 - (g - f_prev) / denom_prev)

    # Accumulate the NEGATED loss (keys are negated errors); wrapper flips sign.
    loss_ref[...] += jnp.sum(nerr * (jac - jac_prev), axis=-1, keepdims=True)
    carry_ref[...] = f[:, T - 1:T]


# ---------------------------------------------------------------------------
# Wrapper
# ---------------------------------------------------------------------------
def _pick_tile(dim, max_tile):
    """Largest power-of-two multiple of 128 dividing `dim`, capped at max_tile.
    Returns 0 if `dim` is not a multiple of 128."""
    best, t = 0, 128
    while t <= min(dim, max_tile):
        if dim % t == 0:
            best = t
        t *= 2
    return best


def _round_up(x, m):
    return ((x + m - 1) // m) * m


def lovasz_softmax_loss(pred_nchw, labels_nhw, *, num_class):
    """Returns the (C,) vector of per-class Lovasz-Softmax losses."""
    N, C, H, W = pred_nchw.shape
    assert C == num_class, "channel dim must equal num_class"
    HW = H * W

    # ---- pad the flattened spatial axis to a lane multiple if needed -------
    # Padded pixels get label -1 -> fg = 0 for every class and error forced to
    # 0 in kernel A, so they contribute exactly 0 to counts and loss.
    HWp = _round_up(HW, 128)
    pred3d = pred_nchw.reshape(N, C, HW)                      # free reshape, native dtype
    labels3d = labels_nhw.reshape(N, 1, HW).astype(jnp.int32)
    if HWp != HW:
        pred3d = jnp.pad(pred3d, ((0, 0), (0, 0), (0, HWp - HW)))
        labels3d = jnp.pad(labels3d, ((0, 0), (0, 0), (0, HWp - HW)),
                           constant_values=-1)
    P = N * HWp

    # ---- kernel A: (N, C, HWp) logits -> (C, P) negated errors + bf16 fg ---
    t_a = _pick_tile(HWp, 16384)                              # big tiles: step-overhead bound otherwise
    n_hw_tiles = HWp // t_a

    nerrs, fgs = pl.pallas_call(
        _softmax_errors_kernel,
        out_shape=(
            jax.ShapeDtypeStruct((C, P), jnp.float32),
            jax.ShapeDtypeStruct((C, P), jnp.bfloat16),
        ),
        grid=(N, n_hw_tiles),
        in_specs=[
            pl.BlockSpec((None, C, t_a), lambda n, t: (n, 0, t)),
            pl.BlockSpec((None, 1, t_a), lambda n, t: (n, 0, t)),
        ],
        out_specs=(
            pl.BlockSpec((C, t_a), lambda n, t: (0, n * n_hw_tiles + t)),
            pl.BlockSpec((C, t_a), lambda n, t: (0, n * n_hw_tiles + t)),
        ),
        compiler_params=pltpu.CompilerParams(
            dimension_semantics=("parallel", "parallel")),
    )(pred3d, labels3d)

    # per-class foreground totals (small fused reduce over the bf16 fg map)
    counts = jnp.sum(fgs, axis=1, keepdims=True, dtype=jnp.float32)   # (C, 1)

    # ---- glue: per-class descending sort of errors, carrying fg along ------
    # Ascending sort on the negated keys == descending on |fg - p|; the bf16
    # fg mask rides along as the payload (half the payload bandwidth).
    # TODO(synk): pack fg into the key's low mantissa bit for a single-operand sort.
    nerr_sorted, fg_sorted = jax.lax.sort((nerrs, fgs), dimension=1, num_keys=1)

    # ---- kernel B: Lovasz gradient + accumulated per-class dot -------------
    t_b = _pick_tile(P, 8192)
    if t_b < 1024:
        # no large power-of-two divisor: pad with zero (err=0, fg=0) entries
        # after the sort -- they contribute exactly 0 to the loss.
        t_b = min(8192, _round_up(P, 128))
    P_pad = _round_up(P, t_b)
    if P_pad != P:
        nerr_sorted = jnp.pad(nerr_sorted, ((0, 0), (0, P_pad - P)))
        fg_sorted = jnp.pad(fg_sorted, ((0, 0), (0, P_pad - P)))
    n_p_tiles = P_pad // t_b

    neg_loss = pl.pallas_call(
        _lovasz_accum_kernel,
        out_shape=jax.ShapeDtypeStruct((C, 1), jnp.float32),
        grid=(n_p_tiles,),
        in_specs=[
            pl.BlockSpec((C, 1), lambda t: (0, 0)),
            pl.BlockSpec((C, t_b), lambda t: (0, t)),
            pl.BlockSpec((C, t_b), lambda t: (0, t)),
        ],
        out_specs=pl.BlockSpec((C, 1), lambda t: (0, 0)),
        scratch_shapes=[pltpu.VMEM((C, 1), jnp.float32)],     # running cumulative fg carry
        compiler_params=pltpu.CompilerParams(
            dimension_semantics=("arbitrary",)),
        # NOTE(v7x): for larger num_class (>= 16) a leading "parallel" class
        # axis would split classes across the two TensorCores; for C=4 keep 1D.
    )(counts, nerr_sorted, fg_sorted)

    return -neg_loss[:, 0]                                     # (C,) per-class losses


# ---------------------------------------------------------------------------
# Pure-JAX reference mirroring the PyTorch module
# ---------------------------------------------------------------------------
def _reference(pred_nchw, labels_nhw, num_class):
    N, C, H, W = pred_nchw.shape
    prob = jax.nn.softmax(pred_nchw.astype(jnp.float32), axis=1)
    prob = jnp.transpose(prob, (0, 2, 3, 1)).reshape(-1, C)
    lbl = labels_nhw.reshape(-1)
    losses = []
    for c in range(num_class):
        fg = (lbl == c).astype(jnp.float32)
        errors = jnp.abs(fg - prob[:, c])
        order = jnp.argsort(-errors)
        e_s = errors[order]
        fg_s = fg[order]
        gts = jnp.sum(fg_s)
        inter = gts - jnp.cumsum(fg_s)
        union = gts + jnp.cumsum(1.0 - fg_s)
        jac = 1.0 - inter / union
        jac = jnp.concatenate([jac[:1], jac[1:] - jac[:-1]])
        losses.append(jnp.dot(e_s, jac))
    return jnp.stack(losses)


if __name__ == "__main__":
    NUM_CLASS = 4
    key = jax.random.PRNGKey(0)
    k1, k2 = jax.random.split(key)
    N, C, H, W = 2, NUM_CLASS, 16, 16
    pred = jax.random.normal(k1, (N, C, H, W), dtype=jnp.float32)
    labels = jax.random.randint(k2, (N, H, W), 0, NUM_CLASS, dtype=jnp.int32)

    out = lovasz_softmax_loss(pred, labels, num_class=NUM_CLASS)
    out = jax.block_until_ready(out)

    ref = _reference(pred, labels, NUM_CLASS)
    np.testing.assert_allclose(np.asarray(out), np.asarray(ref),
                               rtol=1e-4, atol=1e-5)

    print("KERNEL_OK")
</pallas_src>

<mosaic_0001>
module attributes {stable_mosaic.version = 11 : i64} {
  func.func @_softmax_errors_kernel(%arg0: i32, %arg1: i32, %arg2: memref<1x4x256xf32, #tpu.memory_space<vmem>>, %arg3: memref<1x1x256xi32, #tpu.memory_space<vmem>>, %arg4: memref<4x256xf32, #tpu.memory_space<vmem>>, %arg5: memref<4x256xbf16, #tpu.memory_space<vmem>>) attributes {dimension_semantics = [#tpu.dimension_semantics<parallel>, #tpu.dimension_semantics<parallel>], iteration_bounds = array<i64: 2, 1>, scalar_prefetch = 0 : i64, scratch_operands = 0 : i64, tpu.core_type = #tpu.core_type<tc>, window_params = [{transform_indices = @transform_0, window_bounds = array<i64: 1, 4, 256>}, {transform_indices = @transform_1, window_bounds = array<i64: 1, 1, 256>}, {transform_indices = @transform_2, window_bounds = array<i64: 4, 256>}, {transform_indices = @transform_3, window_bounds = array<i64: 4, 256>}]} {
    %c0 = arith.constant 0 : index
    %c0_0 = arith.constant 0 : index
    %c0_1 = arith.constant 0 : index
    %0 = vector.load %arg2[%c0, %c0_0, %c0_1] : memref<1x4x256xf32, #tpu.memory_space<vmem>>, vector<1x4x256xf32>
    %1 = vector.shape_cast %0 : vector<1x4x256xf32> to vector<4x256xf32>
    %c0_2 = arith.constant 0 : index
    %c0_3 = arith.constant 0 : index
    %c0_4 = arith.constant 0 : index
    %2 = vector.load %arg3[%c0_2, %c0_3, %c0_4] : memref<1x1x256xi32, #tpu.memory_space<vmem>>, vector<1x1x256xi32>
    %3 = vector.shape_cast %2 : vector<1x1x256xi32> to vector<1x256xi32>
    %cst = arith.constant dense<0xFF800000> : vector<256xf32>
    %4 = vector.multi_reduction <maximumf>, %1, %cst [0] : vector<4x256xf32> to vector<256xf32>
    %5 = vector.shape_cast %4 : vector<256xf32> to vector<1x256xf32>
    %6 = vector.broadcast %5 : vector<1x256xf32> to vector<4x256xf32>
    %7 = arith.subf %1, %6 : vector<4x256xf32>
    %8 = math.exp %7 : vector<4x256xf32>
    %cst_5 = arith.constant dense<0.000000e+00> : vector<256xf32>
    %9 = vector.multi_reduction <add>, %8, %cst_5 [0] : vector<4x256xf32> to vector<256xf32>
    %10 = vector.shape_cast %9 : vector<256xf32> to vector<1x256xf32>
    %11 = vector.broadcast %10 : vector<1x256xf32> to vector<4x256xf32>
    %12 = arith.divf %8, %11 : vector<4x256xf32>
    %13 = tpu.iota {dimensions = array<i32: 0>} : vector<4x256xi32>
    %14 = vector.broadcast %3 : vector<1x256xi32> to vector<4x256xi32>
    %15 = arith.cmpi eq, %13, %14 : vector<4x256xi32>
    %16 = arith.extui %15 : vector<4x256xi1> to vector<4x256xi32>
    %17 = arith.sitofp %16 : vector<4x256xi32> to vector<4x256xf32>
    %c0_i32 = arith.constant 0 : i32
    %18 = vector.broadcast %c0_i32 : i32 to vector<1x256xi32>
    %19 = arith.cmpi sge, %3, %18 : vector<1x256xi32>
    %20 = arith.subf %17, %12 : vector<4x256xf32>
    %21 = math.absf %20 : vector<4x256xf32>
    %cst_6 = arith.constant 0.000000e+00 : f32
    %22 = vector.broadcast %cst_6 : f32 to vector<4x256xf32>
    %23 = arith.subf %22, %21 : vector<4x256xf32>
    %cst_7 = arith.constant 0.000000e+00 : f32
    %24 = vector.shape_cast %19 : vector<1x256xi1> to vector<1x256xi1>
    %25 = vector.broadcast %24 : vector<1x256xi1> to vector<4x256xi1>
    %26 = vector.broadcast %cst_7 : f32 to vector<4x256xf32>
    %27 = arith.select %25, %23, %26 : vector<4x256xi1>, vector<4x256xf32>
    %c0_8 = arith.constant 0 : index
    %c0_9 = arith.constant 0 : index
    %28 = vector.load %arg4[%c0_8, %c0_9] : memref<4x256xf32, #tpu.memory_space<vmem>>, vector<4x256xf32>
    tpu.vector_store %arg4[%c0_8, %c0_9], %27 {strides = array<i32>} : memref<4x256xf32, #tpu.memory_space<vmem>>, vector<4x256xf32>,
    %29 = arith.extui %15 : vector<4x256xi1> to vector<4x256xi32>
    %30 = arith.sitofp %29 : vector<4x256xi32> to vector<4x256xf32>
    %31 = arith.truncf %30 : vector<4x256xf32> to vector<4x256xbf16>
    %c0_10 = arith.constant 0 : index
    %c0_11 = arith.constant 0 : index
    %32 = vector.load %arg5[%c0_10, %c0_11] : memref<4x256xbf16, #tpu.memory_space<vmem>>, vector<4x256xbf16>
    tpu.vector_store %arg5[%c0_10, %c0_11], %31 {strides = array<i32>} : memref<4x256xbf16, #tpu.memory_space<vmem>>, vector<4x256xbf16>,
    return
  }
  func.func @transform_0(%arg0: i32, %arg1: i32) -> (i32, i32, i32) {
    %c0_i32 = arith.constant 0 : i32
    %c0_i32_0 = arith.constant 0 : i32
    return %arg0, %c0_i32, %arg1 : i32, i32, i32
  }
  func.func @transform_1(%arg0: i32, %arg1: i32) -> (i32, i32, i32) {
    %c0_i32 = arith.constant 0 : i32
    %c0_i32_0 = arith.constant 0 : i32
    return %arg0, %c0_i32, %arg1 : i32, i32, i32
  }
  func.func @transform_2(%arg0: i32, %arg1: i32) -> (i32, i32) {
    %c1_i32 = arith.constant 1 : i32
    %0 = arith.muli %arg0, %c1_i32 : i32
    %1 = arith.addi %0, %arg1 : i32
    %c0_i32 = arith.constant 0 : i32
    %c0_i32_0 = arith.constant 0 : i32
    return %c0_i32, %1 : i32, i32
  }
  func.func @transform_3(%arg0: i32, %arg1: i32) -> (i32, i32) {
    %c1_i32 = arith.constant 1 : i32
    %0 = arith.muli %arg0, %c1_i32 : i32
    %1 = arith.addi %0, %arg1 : i32
    %c0_i32 = arith.constant 0 : i32
    %c0_i32_0 = arith.constant 0 : i32
    return %c0_i32, %1 : i32, i32
  }
}

</mosaic_0001>

<bundles_post_ra>
// kernel: tpu_custom_call.1
= control target key start
LH: loop header
LB: loop body
LE: loop exit
PB: predicated region body
PF: predicated region fallthrough
CT: control target
= control target key end

     0   :  { %9 = vsyncpa [#allocation3], 0  ;;  %s1081_s0 = inlined_call_operand.hbm [shape: f32[2,4,256], index: 0, kind: input, shape index: {}]   ;;  %s1082_s1 = inlined_call_operand.hbm [shape: s32[2,1,256], index: 1, kind: input, shape index: {}]   ;;  %s1083_s2 = inlined_call_operand.hbm [shape: f32[4,512], index: 2, kind: output, shape index: {0}]   ;;  %s1084_s3 = inlined_call_operand.hbm [shape: bf16[4,512], index: 3, kind: output, shape index: {1}]  }
   0x1   :  { %11 = vsyncpa [#allocation3 + $0x1], 0 }
   0x2   :  { %12 = vsyncpa [#allocation6], 0 }
   0x3   :  { %14 = vsyncpa [#allocation6 + $0x1], 0 }
   0x4   :  { %15 = vsyncpa [#allocation4], 0 }
   0x5   :  { %17 = vsyncpa [#allocation4 + $0x1], 0 }
   0x6   :  { %18 = vsyncpa [#allocation9], 0 }
   0x7   :  { %20 = vsyncpa [#allocation9 + $0x1], 0  ;;  %s859_s12 = smov 0   ;;  %s861_s13 = smov 0  }
   0x8   :  { %s863_s14 = smov 0   ;;  %s865_s15 = smov 0  }
   0x9   :  { %s867_s16 = smov 0   ;;  %s869_s17 = smov 0  }
   0xa LB: > { %s551_s18 = sadd.s32 4294967295, %s831_s17   ;;  %s552_s19 = sadd.s32 4294967294, %s831_s17   ;;  %s831_s17 = sphi %s869_s17, %s26_s17   ;;  %s827_s16 = sphi %s867_s16, %s1096_s16   ;;  %s823_s15 = sphi %s865_s15, %s1095_s15   ;;  %s819_s14 = sphi %s863_s14, %s1094_s14   ;;  %s815_s13 = sphi %s861_s13, %s1093_s13   ;;  %s811_s12 = sphi %s859_s12, %s1092_s12  }
   0xb   : > { %s38_s20 = sadd.s32 1, %s827_s16  ;;  %s47_s21 = sadd.s32 1, %s819_s14 }
   0xc   : > { %p40_p0 = scmp.ge.s32.totalorder %s38_s20, 2  ;;  %p54_p1 = scmp.ne.s32.totalorder %s819_s14, %s815_s13 }
   0xd   : > { %p55_p2 = scmp.eq.s32.totalorder %s831_s17, 0  ;;  %p60_p3 = scmp.ne.s32.totalorder %s815_s13, %s811_s12 }
   0xe   : > { %s1098_s20 = smov (%p40_p0, %s38_s20), 0  ;;  %p61_p5 = scmp.eq.s32.totalorder %s551_s18, 0 }
   0xf   : > { %p900_p4 = por %p55_p2, %p54_p1  ;;  %s42_s23 = ssub.s32 %s827_s16, %s1098_s20 }
  0x10   : > { %p114_p6 = scmp.eq.s32.totalorder %s551_s18, 1  ;;  %p45_p7 = scmp.eq.s32.totalorder %s42_s23, 0 }
  0x11   : > { %p906_p8 = por %p61_p5, %p60_p3  ;;  %p120_p10 = scmp.eq.s32.totalorder %s552_s19, 1 }
  0x12   : > { %p910_p9 = por %p114_p6, %p54_p1  ;;  %p604_p13 = scmp.lt.s32.totalorder %s831_s17, 2 }
  0x13   : > { %s915_s26 = scalar_select %p45_p7, %s819_s14, %s47_s21  }
  0x14   : > { %p917_p11 = por %p120_p10, %p60_p3  ;;  %s924_s28 = sand.u32 1, %s819_s14  }
  0x15   : > { %s555_s29 = sshll.u32 %s924_s28, 3  ;;  %s578_s30 = sshll.u32 %s827_s16, 7 }
  0x16   : > { %s180_s6 = scalar_lea.hbm %s1081_s0, %s578_s30  ;;  %s172_s7 = scalar_lea.vmem [#allocation2], %s555_s29 }
  0x17   : > { %s182_s8 = sshll.u32 %s172_s7, 4  ;;  %p933_p0 = pnand %p604_p13, %p900_p4  ;;  %s183_s8 = int_to_ptr.vmem [resolvable:$true] %s182_s8 }
  0x18   : > { %p561_p1 = scmp.ge.s32.totalorder %s831_s17, 1  ;;  %p208_p2 = scmp.lt.s32.totalorder %s831_s17, 3 }
  0x19   : > { %s169_s10 = scalar_lea.sflag [#allocation3], %s924_s28  ;;  %p663_p3 = pneg %p933_p0 }
  0x1a   : > { %s674_s11 = scalar_lea.vmem %s183_s8, 128  ;;  %s833_s18 = smov [#allocation2]  }
  0x1b   : > { %p675_p5 = scmp.ne.s32.totalorder %s183_s8, %s674_s11  ;;  %s679_s19 = sshll.u32 %s833_s18, 4  ;;  %s680_s19 = int_to_ptr.vmem [resolvable:$false] %s679_s19 }
  0x1c   : > { %s681_s21 = scalar_lea.vmem %s680_s19, 256  ;;  %p682_p4 = scmp.lt.s32.totalorder %s183_s8, %s680_s19 }
  0x1d   : > { %p677_p6 = pnand %p675_p5, %p663_p3  ;;  %p683_p10 = scmp.lt.s32.totalorder %s681_s21, %s674_s11 }
  0x1f   : > { %p678_p7 = pneg %p677_p6  ;;  %p684_p13 = por %p683_p10, %p682_p4 }
  0x21   : > { %p685_p12 = pnand %p684_p13, %p678_p7 }
  0x23   : > { %688 = shalt.err (!%p685_p12)
}
  0x24   : > { %593 = dma.hbm_to_vmem [thread:$0]  (!%p933_p0), %s180_s6, 128, %s183_s8, %s169_s10  }
  0x25   : > { %p951_p5 = pnand %p561_p1, %p208_p2  ;;  %s558_s23 = sshll.u32 %s924_s28, 1 }
  0x26   : > { %s579_s29 = sshll.u32 %s827_s16, 5  ;;  %s193_s7 = scalar_lea.vmem [#allocation5], %s558_s23 }
  0x27   : > { %s201_s5 = scalar_lea.hbm %s1082_s1, %s579_s29  ;;  %s203_s11 = sshll.u32 %s193_s7, 4  ;;  %s204_s11 = int_to_ptr.vmem [resolvable:$true] %s203_s11 }
  0x28   : > { %s190_s18 = scalar_lea.sflag [#allocation6], %s924_s28  ;;  %s702_s19 = scalar_lea.vmem %s204_s11, 32 }
  0x29   : > { %p703_p12 = scmp.ne.s32.totalorder %s204_s11, %s702_s19  ;;  %s834_s6 = smov [#allocation5]  }
  0x2a   : > { %s707_s8 = sshll.u32 %s834_s6, 4  ;;  %s708_s8 = int_to_ptr.vmem [resolvable:$false] %s707_s8 }
  0x2b   : > { %p705_p6 = pnand %p703_p12, %p663_p3  ;;  %s709_s10 = scalar_lea.vmem %s708_s8, 64 }
  0x2c   : > { %p710_p1 = scmp.lt.s32.totalorder %s204_s11, %s708_s8  ;;  %p711_p2 = scmp.lt.s32.totalorder %s709_s10, %s702_s19 }
  0x2d   : > { %p706_p7 = pneg %p705_p6 }
  0x2e   : > { %p712_p4 = por %p711_p2, %p710_p1 }
  0x30   : > { %p713_p10 = pnand %p712_p4, %p706_p7 }
  0x32   : > { %716 = shalt.err (!%p713_p10)
}
  0x33   : > { %596 = dma.hbm_to_vmem [thread:$0]  (!%p933_p0), %s201_s5, 32, %s204_s11, %s190_s18  }
  0x34   : > { %212 = sbr.rel (%p951_p5) target bundleno = 168 (0xa8), region = 28  ;;  %s969_s28 = sand.u32 (!%p951_p5), 1, %s815_s13  }
  0x35   : > { %s562_s21 = sshll.u32 (!%p951_p5), %s969_s28, 3  ;;  %s215_s23 = scalar_lea.sflag (!%p951_p5), [#allocation3], %s969_s28 }
  0x36   : > { %s218_s29 = scalar_lea.vmem (!%p951_p5), [#allocation2], %s562_s21 }
  0x39   : > { %794 = dma.done.wait (%p906_p8), %s215_s23, 128  }
  0x3a   : > { %796 = vsyncadd (%p906_p8), %s215_s23, 4294967168  ;;  %s563_s9 = sshll.u32 %s969_s28, 1  ;;  %s224_s22 = scalar_lea.sflag [#allocation6], %s969_s28 }
  0x3b   : > { %s227_s30 = scalar_lea.vmem [#allocation5], %s563_s9 }
  0x3c   : > { %798 = dma.done.wait (%p906_p8), %s224_s22, 32  }
  0x3d   : > { %800 = vsyncadd (%p906_p8), %s224_s22, 4294967264  ;;  %v316_v0 = vlaneseq  ;;  %s565_s4 = sshll.u32 %s969_s28, 2  ;;  %vm271_vm0 = vcmask 1043456   ;;  %v266_v4 = vld [vmem:[%s218_s29] sm:$0xff]  ;;  %v267_v5 = vld [vmem:[%s227_s30] sm:$0x3] }
  0x3e   : > { %v269_v6 = vcombine.high %v266_v4, %v266_v4  ;;  %v272_v7 = vsel %vm271_vm0, %v266_v4, -inf  ;;  %s259_s5 = scalar_lea.vmem [#allocation8], %s565_s4  ;;  %vm332_vm1 = vcmp.ge.s32.totalorder %v267_v5, 0  ;;  %s581_s24 = sshll.u32 %s823_s15, 6  ;;  %v835_v12 = vmov 0  }
  0x3f   : > { %v317_v1 = vshrl.u32 %v316_v0, 7  ;;  %s410_s7 = sshll.u32 %s259_s5, 4  ;;  %v273_v10 = vrot.slane %v272_v7, 4  ;;  %v342_v13 = vsel %vm332_vm1, 1, %v835_v12  ;;  %v836_v16 = vmov 0.0   ;;  %s1004_s19 = scalar_lea.hbm %s1084_s3, %s581_s24  ;;  %s993_s7 = int_to_ptr.vmem [resolvable:$true] %s410_s7 }
  0x40   : > { %v279_v11 = vsel %vm271_vm0, %v269_v6, -inf  ;;  %s380_s6 = scalar_lea.sflag [#allocation9], %s969_s28  ;;  %s717_s8 = scalar_lea.vmem %s993_s7, 64 }
  0x41   : > { %v320_v2 = vsub.s32 0, %v317_v1  ;;  %v324_v3 = vsub.s32 1, %v317_v1  ;;  %v274_v14 = vmax.f32 %v272_v7, %v273_v10  ;;  %v280_v15 = vrot.slane %v279_v11, 4  ;;  %p718_p8 = scmp.ne.s32.totalorder %s993_s7, %s717_s8  ;;  %s837_s10 = smov [#allocation8]  }
  0x42   : > { %s721_s23 = sshll.u32 %s837_s10, 4  ;;  %s722_s23 = int_to_ptr.vmem [resolvable:$false] %s721_s23 }
  0x43   : > { %v321_v8 = vrot.slane %v267_v5, %v320_v2  ;;  %v325_v9 = vrot.slane %v267_v5, %v324_v3  ;;  %v995_v19 = vrot.slane %v342_v13, %v320_v2  ;;  %v997_v20 = vrot.slane %v342_v13, %v324_v3  ;;  %p719_p0 = pnand %p718_p8, %p910_p9  ;;  %s723_s29 = scalar_lea.vmem %s722_s23, 128 }
  0x44   : > { %v275_v22 = vrot.slane %v274_v14, 2  ;;  %v281_v23 = vmax.f32 %v279_v11, %v280_v15  ;;  %p724_p13 = scmp.lt.s32.totalorder %s993_s7, %s722_s23  ;;  %p725_p5 = scmp.lt.s32.totalorder %s723_s29, %s717_s8 }
  0x45   : > { %vm326_vm2 = vcmp.eq.s32.totalorder %v317_v1, %v321_v8  ;;  %vm327_vm3 = vcmp.eq.s32.totalorder %v317_v1, %v325_v9  ;;  %p720_p3 = pneg %p719_p0 }
  0x46   : > { %v989_v17 = vsel %vm326_vm2, 1.0, %v836_v16  ;;  %v991_v18 = vsel %vm327_vm3, 1.0, %v836_v16  ;;  %v276_v24 = vmax.f32 %v274_v14, %v275_v22  ;;  %v282_v25 = vrot.slane %v281_v23, 2  ;;  %p726_p12 = por %p725_p5, %p724_p13 }
  0x47   : > { %v568_v21 = vpack.c.bf16 %v991_v18, %v989_v17 }
  0x48   : > { %p727_p6 = pnand %p726_p12, %p720_p3 }
  0x49   : > { %569 = vst.sshfl [vmem:[%s259_s5] sm:$0x33 pattern:$0x76325410] %v568_v21 }
  0x4a   : > { %730 = shalt.err (!%p727_p6)
}
  0x4b   : > { %s731_s9 = scalar_lea.hbm %s1004_s19, 64  ;;  %s735_s4 = scalar_lea.hbm %s1084_s3, 128 }
  0x4c   : > { %p732_p7 = scmp.ne.s32.totalorder %s1004_s19, %s731_s9  ;;  %p736_p4 = scmp.lt.s32.totalorder %s1004_s19, %s1084_s3 }
  0x4d   : > { %p737_p10 = scmp.lt.s32.totalorder %s735_s4, %s731_s9 }
  0x4e   : > { %p733_p1 = pnand %p732_p7, %p910_p9 }
  0x4f   : > { %p738_p8 = por %p737_p10, %p736_p4 }
  0x50   : > { %p734_p2 = pneg %p733_p1 }
  0x52   : > { %p739_p0 = pnand %p738_p8, %p734_p2 }
  0x54   : > { %742 = shalt.err (!%p739_p0)
}
  0x55   : > { %587 = dma.vmem_to_hbm [thread:$0]  (%p910_p9), %s993_s7, 64, %s1004_s19, %s380_s6   ;;  %v277_v26 = vrot.slane %v276_v24, 1  ;;  %v283_v27 = vmax.f32 %v281_v23, %v282_v25  ;;  %vm351_vm4 = vcmp.eq.s32.totalorder %v995_v19, 1  ;;  %vm352_vm5 = vcmp.eq.s32.totalorder %v997_v20, 1 }
  0x56   : > { %s252_s7 = scalar_lea.vmem [#allocation7], %s562_s21  ;;  %s580_s18 = sshll.u32 %s823_s15, 7 }
  0x57   : > { %v278_v28 = vmax.f32 %v276_v24, %v277_v26  ;;  %v284_v29 = vrot.slane %v283_v27, 1  ;;  %s395_s11 = sshll.u32 %s252_s7, 4  ;;  %s393_s8 = scalar_lea.hbm %s1083_s2, %s580_s18  ;;  %s1036_s11 = int_to_ptr.vmem [resolvable:$true] %s395_s11 }
  0x58   : > { %s375_s10 = scalar_lea.sflag [#allocation4], %s969_s28  ;;  %s743_s23 = scalar_lea.vmem %s1036_s11, 128 }
  0x59   : > { %v285_v30 = vmax.f32 %v283_v27, %v284_v29  ;;  %p744_p3 = scmp.ne.s32.totalorder %s1036_s11, %s743_s23  ;;  %s838_s21 = smov [#allocation7]  }
  0x5a   : > { %s747_s15 = sshll.u32 %s838_s21, 4  ;;  %s748_s15 = int_to_ptr.vmem [resolvable:$false] %s747_s15 }
  0x5b   : > { %v288_v31 = vcombine.low %v278_v28, %v285_v30  ;;  %p745_p13 = pnand %p744_p3, %p910_p9  ;;  %s749_s29 = scalar_lea.vmem %s748_s15, 256 }
  0x5c   : > { %p750_p12 = scmp.lt.s32.totalorder %s1036_s11, %s748_s15  ;;  %p751_p6 = scmp.lt.s32.totalorder %s749_s29, %s743_s23 }
  0x5d   : > { %v290_v32 = vsub.f32 %v266_v4, %v288_v31  ;;  %p746_p5 = pneg %p745_p13 }
  0x5e   : > { %p752_p7 = por %p751_p6, %p750_p12 }
  0x5f   : > { %v291_v33 = vmul.f32 1.442695, %v290_v32 }
  0x60   : > { %p753_p1 = pnand %p752_p7, %p746_p5 }
  0x61   : > { %657 = vpow2.f32 %v291_v33 }
  0x6e   : > { %v658_v34 = vpop.eup %657 }
  0x6f   : > { %v294_v35 = vcombine.high %v658_v34, %v658_v34  ;;  %v296_v36 = vsel %vm271_vm0, %v658_v34, 0.0 }
  0x70   : > { %v297_v37 = vrot.slane %v296_v36, 4 }
  0x71   : > { %v303_v38 = vsel %vm271_vm0, %v294_v35, 0.0 }
  0x72   : > { %v298_v39 = vadd.f32 %v297_v37, %v296_v36  ;;  %v304_v40 = vrot.slane %v303_v38, 4 }
  0x74   : > { %v299_v41 = vrot.slane %v298_v39, 2  ;;  %v305_v42 = vadd.f32 %v304_v40, %v303_v38 }
  0x76   : > { %v300_v43 = vadd.f32 %v299_v41, %v298_v39  ;;  %v306_v44 = vrot.slane %v305_v42, 2 }
  0x78   : > { %v301_v45 = vrot.slane %v300_v43, 1  ;;  %v307_v46 = vadd.f32 %v306_v44, %v305_v42 }
  0x7a   : > { %v302_v47 = vadd.f32 %v301_v45, %v300_v43  ;;  %v308_v48 = vrot.slane %v307_v46, 1 }
  0x7c   : > { %v309_v49 = vadd.f32 %v308_v48, %v307_v46 }
  0x7e   : > { %v312_v50 = vcombine.low %v302_v47, %v309_v49 }
  0x80   : > { %659 = vrcp.f32 %v312_v50 }
  0x8d   : > { %v660_v51 = vpop.eup %659 }
  0x8e   : > { %v315_v52 = vmul.f32 %v660_v51, %v658_v34 }
  0x90   : > { %v334_v53 = vcombine.high %v315_v52, %v315_v52  ;;  %v336_v54 = vsub.f32 %v989_v17, %v315_v52 }
  0x92   : > { %v337_v55 = vsub.f32 %v991_v18, %v334_v53  ;;  %v338_v56 = vand.u32 2147483647, %v336_v54 }
  0x94   : > { %v339_v57 = vand.u32 2147483647, %v337_v55  ;;  %v340_v58 = vsub.f32 0.0, %v338_v56 }
  0x96   : > { %v341_v59 = vsub.f32 0.0, %v339_v57  ;;  %v353_v60 = vsel %vm351_vm4, %v340_v58, 0.0 }
  0x98   : > { %v354_v61 = vsel %vm352_vm5, %v341_v59, 0.0 }
  0x99   : > { %v357_v62 = vcombine.low %v353_v60, %v354_v61 }
  0x9b   : > { %359 = vst [vmem:[%s252_s7] sm:$0xff] %v357_v62 }
  0x9c   : > { %756 = shalt.err (!%p753_p1)
}
  0x9d   : > { %s757_s9 = scalar_lea.hbm %s393_s8, 128  ;;  %s761_s30 = scalar_lea.hbm %s1083_s2, 256 }
  0x9e   : > { %p758_p2 = scmp.ne.s32.totalorder %s393_s8, %s757_s9  ;;  %p762_p8 = scmp.lt.s32.totalorder %s393_s8, %s1083_s2 }
  0x9f   : > { %p763_p0 = scmp.lt.s32.totalorder %s761_s30, %s757_s9 }
  0xa0   : > { %p759_p4 = pnand %p758_p2, %p910_p9 }
  0xa1   : > { %p764_p3 = por %p763_p0, %p762_p8 }
  0xa2   : > { %p760_p10 = pneg %p759_p4 }
  0xa4   : > { %p765_p13 = pnand %p764_p3, %p760_p10 }
  0xa6   : > { %768 = shalt.err (!%p765_p13)
}
  0xa7   : > { %586 = dma.vmem_to_hbm [thread:$0]  (%p910_p9), %s1036_s11, 128, %s393_s8, %s375_s10  }
  0xa8 PF: > { %s422_s24 = sand.u32 1, %s811_s12   ;;  %p1091_p5 = scmp.ge.s32.totalorder %s831_s17, 2 }
  0xa9   : > { %s423_s7 = scalar_lea.sflag [#allocation4], %s422_s24 }
  0xaa   : > { %p598_p12 = pnand %p1091_p5, %p917_p11 }
  0xac   : > { %p599_p6 = pneg %p598_p12 }
  0xae   : > { %802 = dma.done.wait (%p599_p6), %s423_s7, 128  }
  0xaf   : > { %804 = vsyncadd (%p599_p6), %s423_s7, 4294967168  ;;  %s432_s18 = scalar_lea.sflag [#allocation9], %s422_s24 }
  0xb0   : > { %806 = dma.done.wait (%p599_p6), %s432_s18, 64  }
  0xb1   : > { %808 = vsyncadd (%p599_p6), %s432_s18, 4294967232  ;;  %s26_s17 = sadd.s32 1, %s831_s17   ;;  %s1092_s12 = smov %s815_s13 }
  0xb2   : > { %p23_p7 = scmp.ge.s32.totalorder %s26_s17, 4   ;;  %s1093_s13 = smov %s819_s14 }
  0xb3   : > { %s1094_s14 = smov %s915_s26  ;;  %s1095_s15 = smov %s827_s16 }
  0xb4   : > { %s1096_s16 = smov %s1098_s20  ;;  %25 = sbr.rel (!%p23_p7) target bundleno = 10 (0xa), region = 103 }
  0xb9   :  { %437 = vsyncpa [#allocation3], 1 }
  0xba   :  { %439 = vsyncpa [#allocation3 + $0x1], 1 }
  0xbb   :  { %440 = vsyncpa [#allocation6], 1 }
  0xbc   :  { %442 = vsyncpa [#allocation6 + $0x1], 1 }
  0xbd   :  { %443 = vsyncpa [#allocation4], 1 }
  0xbe   :  { %445 = vsyncpa [#allocation4 + $0x1], 1 }
  0xbf   :  { %446 = vsyncpa [#allocation9], 1 }
  0xc0   :  { %448 = vsyncpa [#allocation9 + $0x1], 1 }

</bundles_post_ra>
